<compile_context>
chip_gen: v7x
topology: tpu7x:2x2x1
jax: 0.10.0
libtpu: 0.0.40
codegen_flags: <defaults>
</compile_context>

<pallas_src>
import jax
import jax.numpy as jnp
from jax.experimental import pallas as pl
from jax.experimental.pallas import tpu as pltpu

EPS = 1e-5
MAX_ROW_BLOCK = 512          # sublane-axis tile cap (rows = B*C)
MAX_LANE_BLOCK = 1024        # lane-axis tile cap (cols = H*W)
_VMEM_LIMIT = 32 * 1024 * 1024


def _sublane_multiple(dtype):
    # dtype-native sublane packing: f32 -> 8, bf16/f16 -> 16, int8/fp8 -> 32.
    return max(8, 32 // jnp.dtype(dtype).itemsize)


def _pick_rb(r, sub):
    """Row block: multiple of `sub`; prefer >=2 blocks (megacore in pass 1) and
    an exact divisor of r (no ragged tail)."""
    if r <= sub:
        return r                     # block equals full row extent (allowed)
    target = min(MAX_ROW_BLOCK, max(sub, (r + 1) // 2))
    rb = max(sub, (target // sub) * sub)
    for cand in range(rb, sub - 1, -sub):
        if r % cand == 0:
            return cand
    return rb                        # ragged tail: cdiv grid, OOB writes dropped


def _pick_lb(hw):
    """Lane block + stats accumulator width.  Returns (lb, acc_w, need_mask)."""
    if hw % 128 == 0:
        if hw <= MAX_LANE_BLOCK:
            return hw, 128, False    # single lane block, exact fit
        for cand in (MAX_LANE_BLOCK, 768, 512, 384, 256, 128):
            if hw % cand == 0:
                return cand, 128, False
    if hw < 128:
        return hw, hw, False         # block equals full lane extent (allowed)
    # hw > 128 and not 128-aligned: 128-aligned blocks + masked ragged tail.
    lb = min(MAX_LANE_BLOCK, (hw // 128) * 128)
    return lb, 128, True


# ---------------------------------------------------------------------------
# Pass 1: per-(b, c) partial sums / sums-of-squares into a lane-wide (rb, acc_w)
# f32 accumulator (cross-lane reduce deferred to the wrapper on tiny data).
# ---------------------------------------------------------------------------
def _make_stats_kernel(lb, acc_w, hw, need_mask):
    nchunks = lb // acc_w

    def kernel(x_ref, sum_ref, sq_ref):
        @pl.when(pl.program_id(1) == 0)
        def _init():
            sum_ref[...] = jnp.zeros_like(sum_ref)
            sq_ref[...] = jnp.zeros_like(sq_ref)

        s = sum_ref[...]
        q = sq_ref[...]
        base = pl.program_id(1) * lb
        for j in range(nchunks):                       # static unroll: VALU adds
            x = x_ref[:, j * acc_w:(j + 1) * acc_w].astype(jnp.float32)
            if need_mask:                              # ragged lane tail only
                col = base + j * acc_w + jax.lax.broadcasted_iota(
                    jnp.int32, x.shape, 1)
                x = jnp.where(col < hw, x, 0.0)
            s = s + x
            q = q + x * x
        sum_ref[...] = s
        sq_ref[...] = q

    return kernel


def _row_moments(x2d, rb, lb, acc_w, need_mask):
    r, hw = x2d.shape
    grid = (pl.cdiv(r, rb), pl.cdiv(hw, lb))
    nbytes = x2d.size * x2d.dtype.itemsize
    return pl.pallas_call(
        _make_stats_kernel(lb, acc_w, hw, need_mask),
        grid_spec=pltpu.PrefetchScalarGridSpec(
            num_scalar_prefetch=0,
            grid=grid,
            in_specs=[pl.BlockSpec((rb, lb), lambda i, j: (i, j))],
            out_specs=(pl.BlockSpec((rb, acc_w), lambda i, j: (i, 0)),
                       pl.BlockSpec((rb, acc_w), lambda i, j: (i, 0))),
        ),
        out_shape=(jax.ShapeDtypeStruct((r, acc_w), jnp.float32),
                   jax.ShapeDtypeStruct((r, acc_w), jnp.float32)),
        compiler_params=pltpu.CompilerParams(
            dimension_semantics=("parallel", "arbitrary"),
            vmem_limit_bytes=_VMEM_LIMIT),
        cost_estimate=pl.CostEstimate(
            flops=3 * x2d.size, transcendentals=0, bytes_accessed=nbytes),
    )(x2d)


# ---------------------------------------------------------------------------
# Pass 2: fused normalize + cross-branch modulate: out = x * scale + off.
# ---------------------------------------------------------------------------
def _modulate_kernel(x_ref, so_ref, o_ref):
    x = x_ref[...].astype(jnp.float32)
    scale = so_ref[:, 0:1]
    off = so_ref[:, 1:2]
    o_ref[...] = (x * scale + off).astype(o_ref.dtype)


def _modulate(x2d, so, rb, lb):
    r, hw = x2d.shape
    grid = (pl.cdiv(r, rb), pl.cdiv(hw, lb))
    nbytes = 2 * x2d.size * x2d.dtype.itemsize
    return pl.pallas_call(
        _modulate_kernel,
        grid_spec=pltpu.PrefetchScalarGridSpec(
            num_scalar_prefetch=0,
            grid=grid,
            in_specs=[pl.BlockSpec((rb, lb), lambda i, j: (i, j)),
                      pl.BlockSpec((rb, 2), lambda i, j: (i, 0))],
            out_specs=pl.BlockSpec((rb, lb), lambda i, j: (i, j)),
        ),
        out_shape=jax.ShapeDtypeStruct((r, hw), x2d.dtype),
        compiler_params=pltpu.CompilerParams(
            dimension_semantics=("parallel", "parallel"),
            vmem_limit_bytes=_VMEM_LIMIT),
        cost_estimate=pl.CostEstimate(
            flops=2 * x2d.size, transcendentals=0, bytes_accessed=nbytes),
    )(x2d, so)


# ---------------------------------------------------------------------------
# Wrapper glue (all heavy data movement happens in the two Pallas passes).
# ---------------------------------------------------------------------------
def _bn_se(row_sum, row_sq, hw, gamma, beta, w1, b1, w2, b2):
    """BN batch stats + squeeze-excite attention from per-(b, c) moments only.

    Variance is single-pass E[x^2] - mean^2 in f32 (clamped at 0); fine for
    typical BN inputs.  # TODO(synk): compensated / two-pass variance if inputs
    can be poorly conditioned (|mean| >> std).
    """
    bsz = row_sum.shape[0]
    n = bsz * hw
    mean = row_sum.sum(axis=0) / n                                # (C,)
    var = jnp.maximum(row_sq.sum(axis=0) / n - mean * mean, 0.0)  # (C,)
    inv = jax.lax.rsqrt(var + EPS)                                # (C,)
    # Spatial mean of the *normalized* tensor, derived analytically (no re-read).
    pooled = gamma * (row_sum / hw - mean) * inv + beta           # (B, C)
    z = jnp.maximum(pooled @ w1.T + b1, 0.0)                      # (B, C//2)
    attn = jax.nn.sigmoid(z @ w2.T + b2)                          # (B, C)
    return mean, inv, attn


def _scale_off(mean, inv, gamma, beta, attn_other):
    """Packed per-(b, c) [scale, off] for out = x*scale + off."""
    g = 1.0 + attn_other                                          # (B, C)
    scale = (gamma * inv) * g
    off = (beta - mean * gamma * inv) * g
    b, c = scale.shape
    so = jnp.stack([scale.reshape(b * c), off.reshape(b * c)], axis=-1)
    return so.astype(jnp.float32)                                 # (B*C, 2)


def dual_fourier_attention(Y_l, Y_g, params):
    B, C_l, H_l, W_l = Y_l.shape
    Bg, C_g, H_g, W_g = Y_g.shape
    assert B == Bg, "batch sizes must match"
    assert C_l == C_g, "Y_l * A_g (and Y_g * A_l) requires C_local == C_global"

    def branch_meta(x):
        b, c, h, w = x.shape
        r, hw = b * c, h * w
        rb = _pick_rb(r, _sublane_multiple(x.dtype))
        lb, acc_w, need_mask = _pick_lb(hw)
        return x.reshape(r, hw), (r, hw, rb, lb, acc_w, need_mask)

    xl, (rl, hwl, rbl, lbl, awl, mkl) = branch_meta(Y_l)
    xg, (rg, hwg, rbg, lbg, awg, mkg) = branch_meta(Y_g)

    # Pass 1: one streaming read of each big tensor -> lane-wide partial moments.
    psum_l, psq_l = _row_moments(xl, rbl, lbl, awl, mkl)
    psum_g, psq_g = _row_moments(xg, rbg, lbg, awg, mkg)
    # Final 128->1 lane reduce on tiny (B*C, <=128) arrays (negligible work).
    sum_l = psum_l.sum(axis=1).reshape(B, C_l)
    sq_l = psq_l.sum(axis=1).reshape(B, C_l)
    sum_g = psum_g.sum(axis=1).reshape(B, C_g)
    sq_g = psq_g.sum(axis=1).reshape(B, C_g)

    # Tiny (B, C)-sized math between the two passes.
    mean_l, inv_l, attn_l = _bn_se(
        sum_l, sq_l, hwl, params["gamma_l"][0], params["beta_l"][0],
        params["w1_l"], params["b1_l"][0], params["w2_l"], params["b2_l"][0])
    mean_g, inv_g, attn_g = _bn_se(
        sum_g, sq_g, hwg, params["gamma_g"][0], params["beta_g"][0],
        params["w1_g"], params["b1_g"][0], params["w2_g"], params["b2_g"][0])

    # Bilinear upsampling of a 1x1 attention map == constant broadcast, so the
    # cross-branch modulation folds into a per-(b, c) scale/offset pair.
    so_l = _scale_off(mean_l, inv_l, params["gamma_l"][0], params["beta_l"][0],
                      attn_g)
    so_g = _scale_off(mean_g, inv_g, params["gamma_g"][0], params["beta_g"][0],
                      attn_l)

    # Pass 2: one streaming read + write of each big tensor (no pad, no slice).
    out_l = _modulate(xl, so_l, rbl, lbl)
    out_g = _modulate(xg, so_g, rbg, lbg)
    return (out_l.reshape(B, C_l, H_l, W_l),
            out_g.reshape(B, C_g, H_g, W_g))


# ---------------------------------------------------------------------------
# Pure-JAX reference mirroring the PyTorch forward.
# ---------------------------------------------------------------------------
def reference(Y_l, Y_g, p):
    def bn(x, g, b):
        mean = x.mean(axis=(0, 2, 3), keepdims=True)
        var = ((x - mean) ** 2).mean(axis=(0, 2, 3), keepdims=True)
        return (x - mean) / jnp.sqrt(var + EPS) * g.reshape(1, -1, 1, 1) \
            + b.reshape(1, -1, 1, 1)

    def se(x, w1, b1, w2, b2):
        pooled = x.mean(axis=(2, 3))
        z = jnp.maximum(pooled @ w1.T + b1, 0.0)
        return jax.nn.sigmoid(z @ w2.T + b2)

    yl = bn(Y_l, p["gamma_l"][0], p["beta_l"][0])
    yg = bn(Y_g, p["gamma_g"][0], p["beta_g"][0])
    a_l = se(yl, p["w1_l"], p["b1_l"][0], p["w2_l"], p["b2_l"][0])
    a_g = se(yg, p["w1_g"], p["b1_g"][0], p["w2_g"], p["b2_g"][0])
    return yl * a_g[:, :, None, None] + yl, yg * a_l[:, :, None, None] + yg


def init_params(key, c_l, c_g):
    ks = jax.random.split(key, 8)
    f = jnp.float32
    return {
        "gamma_l": jnp.ones((1, c_l), f), "beta_l": jnp.zeros((1, c_l), f),
        "gamma_g": jnp.ones((1, c_g), f), "beta_g": jnp.zeros((1, c_g), f),
        "w1_l": 0.1 * jax.random.normal(ks[0], (c_l // 2, c_l), f),
        "b1_l": 0.1 * jax.random.normal(ks[1], (1, c_l // 2), f),
        "w2_l": 0.1 * jax.random.normal(ks[2], (c_l, c_l // 2), f),
        "b2_l": 0.1 * jax.random.normal(ks[3], (1, c_l), f),
        "w1_g": 0.1 * jax.random.normal(ks[4], (c_g // 2, c_g), f),
        "b1_g": 0.1 * jax.random.normal(ks[5], (1, c_g // 2), f),
        "w2_g": 0.1 * jax.random.normal(ks[6], (c_g, c_g // 2), f),
        "b2_g": 0.1 * jax.random.normal(ks[7], (1, c_g), f),
        # NOTE: fusion_weight (Linear(C_l+C_g, 2)) is unused in forward -> omitted.
    }


if __name__ == "__main__":
    key = jax.random.PRNGKey(0)
    k1, k2, k3 = jax.random.split(key, 3)

    B, C = 2, 4                     # C_local == C_global (required by the broadcast)
    Y_l = jax.random.normal(k1, (B, C, 16, 16), jnp.float32)   # local branch, 16x16
    Y_g = jax.random.normal(k2, (B, C, 8, 8), jnp.float32)     # global branch, 8x8
    params = init_params(k3, C, C)

    out_l, out_g = dual_fourier_attention(Y_l, Y_g, params)
    jax.block_until_ready((out_l, out_g))

    ref_l, ref_g = reference(Y_l, Y_g, params)
    assert out_l.shape == Y_l.shape and out_g.shape == Y_g.shape
    assert jnp.allclose(out_l, ref_l, atol=1e-4, rtol=1e-4)
    assert jnp.allclose(out_g, ref_g, atol=1e-4, rtol=1e-4)

    print("KERNEL_OK")
</pallas_src>

<mosaic_0001>
module attributes {stable_mosaic.version = 11 : i64} {
  func.func @kernel(%arg0: i32, %arg1: i32, %arg2: memref<8x256xf32, #tpu.memory_space<vmem>>, %arg3: memref<8x128xf32, #tpu.memory_space<vmem>>, %arg4: memref<8x128xf32, #tpu.memory_space<vmem>>) attributes {dimension_semantics = [#tpu.dimension_semantics<parallel>, #tpu.dimension_semantics<arbitrary>], iteration_bounds = array<i64: 1, 1>, scalar_prefetch = 0 : i64, scratch_operands = 0 : i64, tpu.core_type = #tpu.core_type<tc>, window_params = [{transform_indices = @transform_0, window_bounds = array<i64: 8, 256>}, {transform_indices = @transform_1, window_bounds = array<i64: 8, 128>}, {transform_indices = @transform_2, window_bounds = array<i64: 8, 128>}]} {
    %c0_i32 = arith.constant 0 : i32
    %0 = arith.cmpi eq, %arg1, %c0_i32 : i32
    %1 = arith.extui %0 : i1 to i32
    %c0_i32_0 = arith.constant 0 : i32
    %2 = arith.cmpi ne, %1, %c0_i32_0 : i32
    scf.if %2 {
      %cst = arith.constant 0.000000e+00 : f32
      %15 = vector.broadcast %cst : f32 to vector<8x128xf32>
      %c0_11 = arith.constant 0 : index
      %c0_12 = arith.constant 0 : index
      %16 = vector.load %arg3[%c0_11, %c0_12] : memref<8x128xf32, #tpu.memory_space<vmem>>, vector<8x128xf32>
      tpu.vector_store %arg3[%c0_11, %c0_12], %15 {strides = array<i32>} : memref<8x128xf32, #tpu.memory_space<vmem>>, vector<8x128xf32>,
      %cst_13 = arith.constant 0.000000e+00 : f32
      %17 = vector.broadcast %cst_13 : f32 to vector<8x128xf32>
      %c0_14 = arith.constant 0 : index
      %c0_15 = arith.constant 0 : index
      %18 = vector.load %arg4[%c0_14, %c0_15] : memref<8x128xf32, #tpu.memory_space<vmem>>, vector<8x128xf32>
      tpu.vector_store %arg4[%c0_14, %c0_15], %17 {strides = array<i32>} : memref<8x128xf32, #tpu.memory_space<vmem>>, vector<8x128xf32>,
    } else {
    }
    %c0 = arith.constant 0 : index
    %c0_1 = arith.constant 0 : index
    %3 = vector.load %arg3[%c0, %c0_1] : memref<8x128xf32, #tpu.memory_space<vmem>>, vector<8x128xf32>
    %c0_2 = arith.constant 0 : index
    %c0_3 = arith.constant 0 : index
    %4 = vector.load %arg4[%c0_2, %c0_3] : memref<8x128xf32, #tpu.memory_space<vmem>>, vector<8x128xf32>
    %c0_4 = arith.constant 0 : index
    %c0_5 = arith.constant 0 : index
    %5 = vector.load %arg2[%c0_4, %c0_5] : memref<8x256xf32, #tpu.memory_space<vmem>>, vector<8x128xf32>
    %6 = arith.addf %3, %5 : vector<8x128xf32>
    %7 = arith.mulf %5, %5 : vector<8x128xf32>
    %8 = arith.addf %4, %7 : vector<8x128xf32>
    %c0_6 = arith.constant 0 : index
    %c128 = arith.constant 128 : index
    %9 = vector.load %arg2[%c0_6, %c128] : memref<8x256xf32, #tpu.memory_space<vmem>>, vector<8x128xf32>
    %10 = arith.addf %6, %9 : vector<8x128xf32>
    %11 = arith.mulf %9, %9 : vector<8x128xf32>
    %12 = arith.addf %8, %11 : vector<8x128xf32>
    %c0_7 = arith.constant 0 : index
    %c0_8 = arith.constant 0 : index
    %13 = vector.load %arg3[%c0_7, %c0_8] : memref<8x128xf32, #tpu.memory_space<vmem>>, vector<8x128xf32>
    tpu.vector_store %arg3[%c0_7, %c0_8], %10 {strides = array<i32>} : memref<8x128xf32, #tpu.memory_space<vmem>>, vector<8x128xf32>,
    %c0_9 = arith.constant 0 : index
    %c0_10 = arith.constant 0 : index
    %14 = vector.load %arg4[%c0_9, %c0_10] : memref<8x128xf32, #tpu.memory_space<vmem>>, vector<8x128xf32>
    tpu.vector_store %arg4[%c0_9, %c0_10], %12 {strides = array<i32>} : memref<8x128xf32, #tpu.memory_space<vmem>>, vector<8x128xf32>,
    return
  }
  func.func @transform_0(%arg0: i32, %arg1: i32) -> (i32, i32) {
    %c0_i32 = arith.constant 0 : i32
    return %arg0, %arg1 : i32, i32
  }
  func.func @transform_1(%arg0: i32, %arg1: i32) -> (i32, i32) {
    %c0_i32 = arith.constant 0 : i32
    %c0_i32_0 = arith.constant 0 : i32
    return %arg0, %c0_i32 : i32, i32
  }
  func.func @transform_2(%arg0: i32, %arg1: i32) -> (i32, i32) {
    %c0_i32 = arith.constant 0 : i32
    %c0_i32_0 = arith.constant 0 : i32
    return %arg0, %c0_i32 : i32, i32
  }
}

</mosaic_0001>

<bundles_post_ra>
// kernel: tpu_custom_call.1
= control target key start
LH: loop header
LB: loop body
LE: loop exit
PB: predicated region body
PF: predicated region fallthrough
CT: control target
= control target key end

     0   :  { %8 = vsyncpa [#allocation3], 0  ;;  %s201_s0 = inlined_call_operand.hbm [shape: f32[8,256], index: 0, kind: input, shape index: {}]   ;;  %s202_s1 = inlined_call_operand.hbm [shape: f32[8,128], index: 1, kind: output, shape index: {0}]   ;;  %s203_s2 = inlined_call_operand.hbm [shape: f32[8,128], index: 2, kind: output, shape index: {1}]  }
   0x1   :  { %9 = vsyncpa [#allocation4], 0 }
   0x2   :  { %10 = vsyncpa [#allocation7], 0  ;;  %s147_s9 = smov [#allocation2]   ;;  %s75_s13 = scalar_lea.hbm %s201_s0, 256 }
   0x3   :  { %s17_s10 = sshll.u32 %s147_s9, 4  ;;  %p76_p0 = scmp.ne.s32.totalorder %s201_s0, %s75_s13  ;;  %s18_s10 = int_to_ptr.vmem [resolvable:$true] %s17_s10 }
   0x4   :  { %p79_p1 = scmp.lt.u32.totalorder %s75_s13, %s201_s0 }
   0x6   :  { %p81_p2 = pnand %p79_p1, %p76_p0 }
   0x8   :  { %84 = shalt.err (!%p81_p2)
}
   0x9   :  { %s85_s18 = scalar_lea.vmem %s18_s10, 256  ;;  %p90_p4 = scmp.lt.s32.totalorder %s18_s10, %s18_s10 }
   0xa   :  { %p86_p3 = scmp.ne.s32.totalorder %s18_s10, %s85_s18  ;;  %p91_p5 = scmp.lt.s32.totalorder %s85_s18, %s85_s18 }
   0xc   :  { %p92_p6 = por %p91_p5, %p90_p4 }
   0xe   :  { %p93_p7 = pnand %p92_p6, %p86_p3 }
  0x10   :  { %96 = shalt.err (!%p93_p7)
}
  0x11   :  { %20 = dma.hbm_to_vmem [thread:$0]  %s201_s0, 256, %s18_s10, [#allocation3]  }
  0x12   :  { %141 = dma.done.wait [#allocation3], 256  }
  0x13   :  { %142 = vsyncadd [#allocation3], 4294967040  ;;  %v32_v0 = vld [vmem:[#allocation2] sm:$0xff]  ;;  %v36_v1 = vld [vmem:[#allocation2 + $0x8] sm:$0xff]  ;;  %s148_s21 = smov [#allocation5]   ;;  %s149_s23 = smov [#allocation6]  }
  0x14   :  { %s48_s22 = sshll.u32 %s148_s21, 4  ;;  %v34_v2 = vmul.f32 %v32_v0, %v32_v0  ;;  %v38_v3 = vmul.f32 %v36_v1, %v36_v1  ;;  %s58_s24 = sshll.u32 %s149_s23, 4  ;;  %v37_v4 = vadd.f32 %v36_v1, %v32_v0  ;;  %s49_s22 = int_to_ptr.vmem [resolvable:$true] %s48_s22  ;;  %s59_s24 = int_to_ptr.vmem [resolvable:$true] %s58_s24 }
  0x15   :  { %s97_s25 = scalar_lea.vmem %s49_s22, 128  ;;  %p102_p9 = scmp.lt.s32.totalorder %s49_s22, %s49_s22 }
  0x16   :  { %40 = vst [vmem:[#allocation5] sm:$0xff] %v37_v4  ;;  %v39_v5 = vadd.f32 %v38_v3, %v34_v2  ;;  %p98_p8 = scmp.ne.s32.totalorder %s49_s22, %s97_s25  ;;  %p103_p10 = scmp.lt.s32.totalorder %s97_s25, %s97_s25 }
  0x18   :  { %p104_p11 = por %p103_p10, %p102_p9 }
  0x1a   :  { %p105_p12 = pnand %p104_p11, %p98_p8 }
  0x1c   :  { %108 = shalt.err (!%p105_p12)
}
  0x1d   :  { %s109_s27 = scalar_lea.hbm %s202_s1, 128 }
  0x1e   :  { %p110_p13 = scmp.ne.s32.totalorder %s202_s1, %s109_s27  ;;  %p113_p0 = scmp.lt.u32.totalorder %s109_s27, %s202_s1 }
  0x20   :  { %p115_p1 = pnand %p113_p0, %p110_p13 }
  0x22   :  { %118 = shalt.err (!%p115_p1)
}
  0x23   :  { %51 = dma.vmem_to_hbm [thread:$0]  %s49_s22, 128, %s202_s1, [#allocation4]   ;;  %41 = vst [vmem:[#allocation6] sm:$0xff] %v39_v5 }
  0x24   :  { %s119_s6 = scalar_lea.vmem %s59_s24, 128  ;;  %p124_p3 = scmp.lt.s32.totalorder %s59_s24, %s59_s24 }
  0x25   :  { %p120_p2 = scmp.ne.s32.totalorder %s59_s24, %s119_s6  ;;  %p125_p4 = scmp.lt.s32.totalorder %s119_s6, %s119_s6 }
  0x27   :  { %p126_p5 = por %p125_p4, %p124_p3 }
  0x29   :  { %p127_p6 = pnand %p126_p5, %p120_p2 }
  0x2b   :  { %130 = shalt.err (!%p127_p6)
}
  0x2c   :  { %s131_s9 = scalar_lea.hbm %s203_s2, 128 }
  0x2d   :  { %p132_p7 = scmp.ne.s32.totalorder %s203_s2, %s131_s9  ;;  %p135_p8 = scmp.lt.u32.totalorder %s131_s9, %s203_s2 }
  0x2f   :  { %p137_p9 = pnand %p135_p8, %p132_p7 }
  0x31   :  { %140 = shalt.err (!%p137_p9)
}
  0x32   :  { %61 = dma.vmem_to_hbm [thread:$0]  %s59_s24, 128, %s203_s2, [#allocation7]  }
  0x33   :  { %143 = dma.done.wait [#allocation4], 128  }
  0x34   :  { %144 = vsyncadd [#allocation4], 4294967168 }
  0x35   :  { %145 = dma.done.wait [#allocation7], 128  }
  0x36   :  { %146 = vsyncadd [#allocation7], 4294967168 }
  0x37   :  { %68 = vsyncpa [#allocation3], 1 }
  0x38   :  { %69 = vsyncpa [#allocation4], 1 }
  0x39   :  { %70 = vsyncpa [#allocation7], 1 }

</bundles_post_ra>
